<compile_context>
chip_gen: v5e
topology: v5e:2x2
jax: 0.10.0
libtpu: 0.0.40
codegen_flags: <defaults>
</compile_context>

<pallas_src>
import functools

import jax
import jax.numpy as jnp
import numpy as np
from jax import lax
from jax.experimental import pallas as pl
from jax.experimental.pallas import tpu as pltpu

_LANES = 128


def _ece_partial_kernel(bounds_ref, logits_ref, labels_ref, out_ref, *,
                        n_rows: int, padded_rows: int, tile_n: int,
                        steps_per_core: int):
    p = pl.program_id(0)          # parallel (core) axis
    i = pl.program_id(1)          # reduction axis over row tiles

    # Per-core (2, n_bins padded to 128) accumulator lives in the output block
    # (same block index for every i -> resident in VMEM across the reduction).
    @pl.when(i == 0)
    def _init():
        out_ref[...] = jnp.zeros_like(out_ref)

    logits = logits_ref[...].astype(jnp.float32)               # (tile_n, C)
    labels = labels_ref[...]                                   # (tile_n, 1)
    tn, c = logits.shape

    # conf = max(softmax) = exp(0) / sum(exp(x - rowmax)) = 1 / sum_exp.
    row_max = jnp.max(logits, axis=1, keepdims=True)           # (tile_n, 1)
    sum_exp = jnp.sum(jnp.exp(logits - row_max), axis=1, keepdims=True)
    conf = 1.0 / sum_exp                                       # (tile_n, 1)

    # pred = first argmax of the logits (softmax is monotone -> same argmax).
    col_idx = lax.broadcasted_iota(jnp.int32, (tn, c), 1)
    pred = jnp.min(jnp.where(logits == row_max, col_idx, jnp.int32(c)),
                   axis=1, keepdims=True)                      # (tile_n, 1)
    acc = (pred == labels).astype(jnp.float32)                 # (tile_n, 1)

    # Ragged tail / over-allocated logical blocks: kill invalid rows with a
    # cheap (tile_n, 1) select BEFORE anything multiplies them.  conf = 2.0
    # can never satisfy conf <= hi, so those rows fall into no bin.
    if n_rows != padded_rows:                                  # static Python
        row0 = (p * steps_per_core + i) * tile_n
        row = row0 + lax.broadcasted_iota(jnp.int32, (tn, 1), 0)
        valid = row < n_rows
        conf = jnp.where(valid, conf, jnp.float32(2.0))
        acc = jnp.where(valid, acc, jnp.float32(0.0))

    # Lane-dense one-hot binning against the exact float32 linspace boundary
    # constants; pad lanes have lo=2 / hi=-1 so they can never fire.  The lane
    # broadcast of conf is hoisted and reused by both compares.
    lo = bounds_ref[0:1, :]                                    # (1, 128)
    hi = bounds_ref[1:2, :]                                    # (1, 128)
    conf_b = jnp.broadcast_to(conf, (tn, _LANES))              # (tile_n, 128)
    in_bin_f = ((conf_b > lo) & (conf_b <= hi)).astype(jnp.float32)

    # MXU offload: [conf | acc]^T (2, tile_n) x in_bin_f (tile_n, 128)
    # -> (2, 128) per-bin [sum conf; sum acc], accumulated into the output.
    stacked = jnp.concatenate([conf, acc], axis=1)             # (tile_n, 2)
    partial = lax.dot_general(
        stacked, in_bin_f,
        dimension_numbers=(((0,), (0,)), ((), ())),
        preferred_element_type=jnp.float32)                    # (2, 128)
    out_ref[...] += partial[None, :, :]


def ece_loss(y_pred, y_true, n_bins: int = 15, *, block_rows=None):
    """Pallas TPU implementation of ECE_LOSS.forward. Returns shape (1,) f32."""
    assert y_pred.ndim == 2
    assert n_bins <= _LANES, "lane-dense binning supports n_bins <= 128"
    n, c = y_pred.shape

    # Packed sublane tile of the input dtype (f32: 8 rows, bf16: 16, int8: 32).
    itemsize = jnp.dtype(y_pred.dtype).itemsize
    sub = max(8, 32 // max(1, itemsize))

    # Row tile sized by bytes (~6 MiB of logits per buffer), capped at 4096
    # rows so the (tile_n, 128) binning temporaries stay small.
    if block_rows is None:
        budget_bytes = 6 * 1024 * 1024
        tile_n = min(4096, budget_bytes // max(1, c * itemsize))
    else:
        tile_n = block_rows
    tile_n = max(sub, (tile_n // sub) * sub)
    n_rounded = ((n + sub - 1) // sub) * sub
    tile_n = max(sub, min(tile_n, n_rounded))

    total_blocks = pl.cdiv(n, tile_n)          # actual row blocks in the input
    n_par = 2 if total_blocks >= 2 else 1      # 2-way split for v7x's 2 TCs
    steps_per_core = pl.cdiv(total_blocks, n_par)
    padded_rows = n_par * steps_per_core * tile_n
    last_block = total_blocks - 1

    labels = y_true.reshape(n, 1).astype(jnp.int32)

    # (lo, hi] boundaries from the exact float32 linspace, packed lane-dense.
    boundaries = np.linspace(0.0, 1.0, n_bins + 1, dtype=np.float32)
    bounds_np = np.empty((2, _LANES), dtype=np.float32)
    bounds_np[0, :] = 2.0          # pad lanes: conf > 2 is never true
    bounds_np[1, :] = -1.0
    bounds_np[0, :n_bins] = boundaries[:-1]
    bounds_np[1, :n_bins] = boundaries[1:]
    bounds = jnp.asarray(bounds_np)

    kernel = functools.partial(
        _ece_partial_kernel, n_rows=n, padded_rows=padded_rows,
        tile_n=tile_n, steps_per_core=steps_per_core)

    def row_block(pi, ii):
        # Clamp so logical blocks past the end of the array re-read a valid
        # block; their rows are masked out in-kernel via the row-index check.
        return jnp.minimum(pi * steps_per_core + ii, last_block)

    partials = pl.pallas_call(
        kernel,
        out_shape=jax.ShapeDtypeStruct((n_par, 2, _LANES), jnp.float32),
        grid_spec=pltpu.PrefetchScalarGridSpec(
            num_scalar_prefetch=0,
            grid=(n_par, steps_per_core),
            in_specs=[
                pl.BlockSpec((2, _LANES), lambda pi, ii: (0, 0)),
                pl.BlockSpec((tile_n, c), lambda pi, ii: (row_block(pi, ii), 0)),
                pl.BlockSpec((tile_n, 1), lambda pi, ii: (row_block(pi, ii), 0)),
            ],
            out_specs=pl.BlockSpec((1, 2, _LANES), lambda pi, ii: (pi, 0, 0)),
        ),
        compiler_params=pltpu.CompilerParams(
            dimension_semantics=("parallel", "arbitrary"),
            vmem_limit_bytes=48 * 1024 * 1024),
    )(bounds, y_pred, labels)

    # Tiny XLA epilogue: |.| must be applied to the GLOBAL per-bin sums.
    sums = jnp.sum(partials, axis=0)                           # (2, 128)
    diff = jnp.abs(sums[0] - sums[1])                          # (128,)
    ece = jnp.sum(diff[:n_bins]) * jnp.float32(1.0 / n)
    return jnp.reshape(ece, (1,)).astype(jnp.float32)


def _ece_reference(y_pred, y_true, n_bins=15):
    """Pure-JAX reference mirroring the PyTorch loop."""
    boundaries = np.linspace(0.0, 1.0, n_bins + 1, dtype=np.float32)
    sm = jax.nn.softmax(y_pred.astype(jnp.float32), axis=1)
    conf = jnp.max(sm, axis=1)
    pred = jnp.argmax(sm, axis=1)
    acc = (pred == y_true).astype(jnp.float32)
    n = y_pred.shape[0]
    ece = 0.0
    for b in range(n_bins):
        in_bin = (conf > boundaries[b]) & (conf <= boundaries[b + 1])
        s_conf = jnp.sum(jnp.where(in_bin, conf, 0.0))
        s_acc = jnp.sum(jnp.where(in_bin, acc, 0.0))
        ece = ece + jnp.abs(s_conf - s_acc) / n
    return jnp.reshape(ece, (1,))


if __name__ == "__main__":
    key = jax.random.PRNGKey(0)
    k1, k2, k3, k4, k5, k6 = jax.random.split(key, 6)

    # Case 1: small, even shapes (single block, single core).
    batch, num_classes = 64, 10
    y_pred = jax.random.normal(k1, (batch, num_classes), jnp.float32) * 2.0
    y_true = jax.random.randint(k2, (batch,), 0, num_classes, dtype=jnp.int32)
    ece = ece_loss(y_pred, y_true, n_bins=15)
    jax.block_until_ready(ece)
    ref = _ece_reference(y_pred, y_true, n_bins=15)
    np.testing.assert_allclose(np.asarray(ece), np.asarray(ref),
                               rtol=1e-5, atol=2e-6)

    # Case 2: odd batch / class counts (ragged single block, in-kernel mask,
    # no wrapper-side padding).
    batch2, num_classes2 = 130, 21
    y_pred2 = jax.random.normal(k3, (batch2, num_classes2), jnp.float32) * 3.0
    y_true2 = jax.random.randint(k4, (batch2,), 0, num_classes2, dtype=jnp.int32)
    ece2 = ece_loss(y_pred2, y_true2, n_bins=15)
    jax.block_until_ready(ece2)
    ref2 = _ece_reference(y_pred2, y_true2, n_bins=15)
    np.testing.assert_allclose(np.asarray(ece2), np.asarray(ref2),
                               rtol=1e-5, atol=2e-6)

    # Case 3: bf16 logits with a forced small row tile -> multi-step grid,
    # 2-way parallel split, clamped out-of-range logical blocks, ragged tail.
    batch3, num_classes3 = 530, 16
    y_pred3 = (jax.random.normal(k5, (batch3, num_classes3), jnp.float32)
               * 3.0).astype(jnp.bfloat16)
    y_true3 = jax.random.randint(k6, (batch3,), 0, num_classes3, dtype=jnp.int32)
    ece3 = ece_loss(y_pred3, y_true3, n_bins=15, block_rows=64)
    jax.block_until_ready(ece3)
    ref3 = _ece_reference(y_pred3, y_true3, n_bins=15)
    np.testing.assert_allclose(np.asarray(ece3), np.asarray(ref3),
                               rtol=1e-5, atol=2e-6)

    print("KERNEL_OK")
</pallas_src>

<mosaic_0001>
module attributes {stable_mosaic.version = 11 : i64} {
  func.func @_ece_partial_kernel(%arg0: i32, %arg1: i32, %arg2: memref<2x128xf32, #tpu.memory_space<vmem>>, %arg3: memref<64x10xf32, #tpu.memory_space<vmem>>, %arg4: memref<64x1xi32, #tpu.memory_space<vmem>>, %arg5: memref<1x2x128xf32, #tpu.memory_space<vmem>>) attributes {dimension_semantics = [#tpu.dimension_semantics<parallel>, #tpu.dimension_semantics<arbitrary>], iteration_bounds = array<i64: 1, 1>, scalar_prefetch = 0 : i64, scratch_operands = 0 : i64, tpu.core_type = #tpu.core_type<tc>, window_params = [{pipeline_mode = #tpu.pipeline_mode<synchronous>, transform_indices = @transform_0, window_bounds = array<i64: 2, 128>}, {transform_indices = @transform_1, window_bounds = array<i64: 64, 10>}, {transform_indices = @transform_2, window_bounds = array<i64: 64, 1>}, {transform_indices = @transform_3, window_bounds = array<i64: 1, 2, 128>}]} {
    %c0_i32 = arith.constant 0 : i32
    %0 = arith.cmpi eq, %arg1, %c0_i32 : i32
    %1 = arith.extui %0 : i1 to i32
    %c0_i32_0 = arith.constant 0 : i32
    %2 = arith.cmpi ne, %1, %c0_i32_0 : i32
    scf.if %2 {
      %cst_17 = arith.constant 0.000000e+00 : f32
      %41 = vector.broadcast %cst_17 : f32 to vector<1x2x128xf32>
      %c0_18 = arith.constant 0 : index
      %c0_19 = arith.constant 0 : index
      %c0_20 = arith.constant 0 : index
      %42 = vector.load %arg5[%c0_18, %c0_19, %c0_20] : memref<1x2x128xf32, #tpu.memory_space<vmem>>, vector<1x2x128xf32>
      tpu.vector_store %arg5[%c0_18, %c0_19, %c0_20], %41 {strides = array<i32>} : memref<1x2x128xf32, #tpu.memory_space<vmem>>, vector<1x2x128xf32>,
    } else {
    }
    %c0 = arith.constant 0 : index
    %c0_1 = arith.constant 0 : index
    %3 = vector.load %arg3[%c0, %c0_1] : memref<64x10xf32, #tpu.memory_space<vmem>>, vector<64x10xf32>
    %c0_2 = arith.constant 0 : index
    %c0_3 = arith.constant 0 : index
    %4 = vector.load %arg4[%c0_2, %c0_3] : memref<64x1xi32, #tpu.memory_space<vmem>>, vector<64x1xi32>
    %cst = arith.constant dense<0xFF800000> : vector<64xf32>
    %5 = vector.multi_reduction <maximumf>, %3, %cst [1] : vector<64x10xf32> to vector<64xf32>
    %6 = vector.shape_cast %5 : vector<64xf32> to vector<64x1xf32>
    %7 = vector.broadcast %6 : vector<64x1xf32> to vector<64x10xf32>
    %8 = arith.subf %3, %7 : vector<64x10xf32>
    %9 = math.exp %8 : vector<64x10xf32>
    %cst_4 = arith.constant dense<0.000000e+00> : vector<64xf32>
    %10 = vector.multi_reduction <add>, %9, %cst_4 [1] : vector<64x10xf32> to vector<64xf32>
    %11 = vector.shape_cast %10 : vector<64xf32> to vector<64x1xf32>
    %cst_5 = arith.constant 1.000000e+00 : f32
    %12 = vector.broadcast %cst_5 : f32 to vector<64x1xf32>
    %13 = arith.divf %12, %11 : vector<64x1xf32>
    %14 = tpu.iota {dimensions = array<i32: 1>} : vector<64x10xi32>
    %15 = vector.broadcast %6 : vector<64x1xf32> to vector<64x10xf32>
    %16 = arith.cmpf oeq, %3, %15 : vector<64x10xf32>
    %c10_i32 = arith.constant 10 : i32
    %17 = vector.broadcast %c10_i32 : i32 to vector<64x10xi32>
    %18 = arith.select %16, %14, %17 : vector<64x10xi1>, vector<64x10xi32>
    %cst_6 = arith.constant dense<2147483647> : vector<64xi32>
    %19 = vector.multi_reduction <minsi>, %18, %cst_6 [1] : vector<64x10xi32> to vector<64xi32>
    %20 = vector.shape_cast %19 : vector<64xi32> to vector<64x1xi32>
    %21 = arith.cmpi eq, %20, %4 : vector<64x1xi32>
    %22 = arith.extui %21 : vector<64x1xi1> to vector<64x1xi32>
    %23 = arith.sitofp %22 : vector<64x1xi32> to vector<64x1xf32>
    %c0_7 = arith.constant 0 : index
    %c0_8 = arith.constant 0 : index
    %24 = vector.load %arg2[%c0_7, %c0_8] : memref<2x128xf32, #tpu.memory_space<vmem>>, vector<1x128xf32>
    %c1 = arith.constant 1 : index
    %c0_9 = arith.constant 0 : index
    %25 = vector.load %arg2[%c1, %c0_9] : memref<2x128xf32, #tpu.memory_space<vmem>>, vector<1x128xf32>
    %26 = vector.shape_cast %13 : vector<64x1xf32> to vector<64x1xf32>
    %27 = vector.broadcast %26 : vector<64x1xf32> to vector<64x128xf32>
    %28 = vector.broadcast %24 : vector<1x128xf32> to vector<64x128xf32>
    %29 = arith.cmpf ogt, %27, %28 : vector<64x128xf32>
    %30 = vector.broadcast %25 : vector<1x128xf32> to vector<64x128xf32>
    %31 = arith.cmpf ole, %27, %30 : vector<64x128xf32>
    %32 = arith.andi %29, %31 : vector<64x128xi1>
    %33 = arith.extui %32 : vector<64x128xi1> to vector<64x128xi32>
    %34 = arith.sitofp %33 : vector<64x128xi32> to vector<64x128xf32>
    %35 = tpu.concatenate %13, %23 in 1 : vector<64x1xf32>, vector<64x1xf32> -> vector<64x2xf32>
    %cst_10 = arith.constant dense<0.000000e+00> : vector<2x128xf32>
    %36 = tpu.matmul %35, %34, %cst_10 {dimension_numbers = #tpu.dot_dimension_numbers<[0], [0], [1], [1], [0, 1, 1, 1], [], []>} : vector<64x2xf32>, vector<64x128xf32>, vector<2x128xf32> -> vector<2x128xf32>
    %c0_11 = arith.constant 0 : index
    %c0_12 = arith.constant 0 : index
    %c0_13 = arith.constant 0 : index
    %37 = vector.load %arg5[%c0_11, %c0_12, %c0_13] : memref<1x2x128xf32, #tpu.memory_space<vmem>>, vector<1x2x128xf32>
    %38 = vector.shape_cast %36 : vector<2x128xf32> to vector<1x2x128xf32>
    %39 = arith.addf %37, %38 : vector<1x2x128xf32>
    %c0_14 = arith.constant 0 : index
    %c0_15 = arith.constant 0 : index
    %c0_16 = arith.constant 0 : index
    %40 = vector.load %arg5[%c0_14, %c0_15, %c0_16] : memref<1x2x128xf32, #tpu.memory_space<vmem>>, vector<1x2x128xf32>
    tpu.vector_store %arg5[%c0_14, %c0_15, %c0_16], %39 {strides = array<i32>} : memref<1x2x128xf32, #tpu.memory_space<vmem>>, vector<1x2x128xf32>,
    return
  }
  func.func @transform_0(%arg0: i32, %arg1: i32) -> (i32, i32) {
    %c0_i32 = arith.constant 0 : i32
    %c0_i32_0 = arith.constant 0 : i32
    %c0_i32_1 = arith.constant 0 : i32
    return %c0_i32, %c0_i32_0 : i32, i32
  }
  func.func @transform_1(%arg0: i32, %arg1: i32) -> (i32, i32) {
    %c1_i32 = arith.constant 1 : i32
    %0 = arith.muli %arg0, %c1_i32 : i32
    %1 = arith.addi %0, %arg1 : i32
    %c0_i32 = arith.constant 0 : i32
    %2 = arith.minsi %1, %c0_i32 : i32
    %c0_i32_0 = arith.constant 0 : i32
    %c0_i32_1 = arith.constant 0 : i32
    return %2, %c0_i32_0 : i32, i32
  }
  func.func @transform_2(%arg0: i32, %arg1: i32) -> (i32, i32) {
    %c1_i32 = arith.constant 1 : i32
    %0 = arith.muli %arg0, %c1_i32 : i32
    %1 = arith.addi %0, %arg1 : i32
    %c0_i32 = arith.constant 0 : i32
    %2 = arith.minsi %1, %c0_i32 : i32
    %c0_i32_0 = arith.constant 0 : i32
    %c0_i32_1 = arith.constant 0 : i32
    return %2, %c0_i32_0 : i32, i32
  }
  func.func @transform_3(%arg0: i32, %arg1: i32) -> (i32, i32, i32) {
    %c0_i32 = arith.constant 0 : i32
    %c0_i32_0 = arith.constant 0 : i32
    %c0_i32_1 = arith.constant 0 : i32
    return %arg0, %c0_i32, %c0_i32_0 : i32, i32, i32
  }
}

</mosaic_0001>

<bundles_post_ra>
// kernel: tpu_custom_call.1
= control target key start
LH: loop header
LB: loop body
LE: loop exit
PB: predicated region body
PF: predicated region fallthrough
CT: control target
= control target key end

     0   :  { %vm100_vm0 = vcmask 80896   ;;  %s1224_s0 = inlined_call_operand.vmem [shape: f32[2,128], index: 0, kind: input, shape index: {}]   ;;  %s1225_s1 = inlined_call_operand.vmem [shape: f32[64,10], index: 1, kind: input, shape index: {}]   ;;  %s1226_s2 = inlined_call_operand.vmem [shape: s32[64,1], index: 2, kind: input, shape index: {}]   ;;  %s1227_s3 = inlined_call_operand.hbm [shape: f32[1,2,128], index: 3, kind: output, shape index: {}]  }
   0x1   :  { %v748_v0 = vld [vmem:[%s1225_s1 + $0x20] sm:$0xff]  ;;  %v753_v1 = vld [vmem:[%s1225_s1 + $0x10] sm:$0xff]  ;;  %v769_v6 = vld [vmem:[%s1225_s1 + $0x28] sm:$0xff] }
   0x2   :  { %v758_v2 = vld [vmem:[%s1225_s1] sm:$0xff]  ;;  %v113_v3 = vsel %vm100_vm0, %v748_v0, -inf  ;;  %v107_v4 = vsel %vm100_vm0, %v753_v1, -inf  ;;  %v774_v7 = vld [vmem:[%s1225_s1 + $0x18] sm:$0xff] }
   0x3   :  { %v101_v5 = vsel %vm100_vm0, %v758_v2, -inf  ;;  %114 = vmax.xlane.f32.xlu2 %v113_v3  ;;  %108 = vmax.xlane.f32.xlu1 %v107_v4 }
   0x4   :  { %102 = vmax.xlane.f32.xlu0 %v101_v5 }
   0x5   :  { %8 = vsyncpa [#allocation3], 0  ;;  %v85_v8 = vld [vmem:[%s1225_s1 + $0x8] sm:$0xff]  ;;  %v116_v9 = vsel %vm100_vm0, %v769_v6, -inf  ;;  %v110_v10 = vsel %vm100_vm0, %v774_v7, -inf  ;;  %v787_v12 = vld [vmem:[%s1225_s1 + $0x38] sm:$0xff]  ;;  %v293_v16 = vlaneseq }
   0x6   :  { %v104_v11 = vsel %vm100_vm0, %v85_v8, -inf  ;;  %v792_v13 = vld [vmem:[%s1225_s1 + $0x30] sm:$0xff]  ;;  %v122_v14 = vsel %vm100_vm0, %v787_v12, -inf  ;;  %s722_s29 = smov 1   ;;  %s606_s23 = sshll.u32 %s1227_s3, 4  ;;  %s607_s23 = int_to_ptr.hbm [resolvable:$true] %s606_s23 }
   0x7   :  { %v119_v15 = vsel %vm100_vm0, %v792_v13, -inf  ;;  %v294_v17 = vand.u32 127, %v293_v16 }
   0xb   :  { %117 = vmax.xlane.f32.xlu2 %v116_v9  ;;  %111 = vmax.xlane.f32.xlu1 %v110_v10 }
   0xc   :  { %105 = vmax.xlane.f32.xlu0 %v104_v11 }
  0x13   :  { %123 = vmax.xlane.f32.xlu1 %v122_v14 }
  0x14   :  { %120 = vmax.xlane.f32.xlu0 %v119_v15 }
  0x76   :  { %v115_v18 = vpop.xlane.xlu2 %114  ;;  %v109_v19 = vpop.xlane.xlu1 %108 }
  0x77   :  { %vm297_vm1 = vcmp.eq.f32.partialorder %v753_v1, %v109_v19  ;;  %v799_v20 = vpop.xlane.xlu0 %102  ;;  %vm299_vm3 = vcmp.eq.f32.partialorder %v748_v0, %v115_v18  ;;  %v129_v40 = vsub.f32 %v748_v0, %v115_v18  ;;  %v127_v44 = vsub.f32 %v753_v1, %v109_v19 }
  0x78   :  { %v305_v21 = vsel %vm297_vm1, %v294_v17, 10  ;;  %vm295_vm2 = vcmp.eq.f32.partialorder %v758_v2, %v799_v20  ;;  %v307_v35 = vsel %vm299_vm3, %v294_v17, 10  ;;  %v125_v0 = vsub.f32 %v758_v2, %v799_v20 }
  0x79   :  { %v303_v22 = vsel %vm295_vm2, %v294_v17, 10  ;;  %v804_v23 = vsel %vm100_vm0, %v305_v21, 2147483647  ;;  %v842_v48 = vsel %vm100_vm0, %v307_v35, 2147483647 }
  0x7a   :  { %v807_v24 = vsel %vm100_vm0, %v303_v22, 2147483647  ;;  %v343_v25 = vshra.s32 %v804_v23, 16  ;;  %v141_v51 = vmul.f32 1.442695, %v129_v40  ;;  %v373_v54 = vshra.s32 %v842_v48, 16 }
  0x7b   :  { %v313_v26 = vshra.s32 %v807_v24, 16  ;;  %v137_v53 = vmul.f32 1.442695, %v127_v44  ;;  %v372_v44 = vand.u32 65535, %v842_v48 }
  0x7c   :  { %v811_v27 = vcvt.s32.f32 %v343_v25  ;;  %v860_v61 = vcvt.s32.f32 %v373_v54 }
  0x7d   :  { %v813_v28 = vcvt.s32.f32 %v313_v26  ;;  %v342_v26 = vand.u32 65535, %v804_v23 }
  0x7e   :  { %v118_v29 = vpop.xlane.xlu2 %117  ;;  %v816_v30 = vpop.xlane.xlu1 %111  ;;  %346 = vmin.xlane.f32.xlu1 %v811_v27 }
  0x7f   :  { %vm300_vm4 = vcmp.eq.f32.partialorder %v769_v6, %v118_v29  ;;  %vm298_vm5 = vcmp.eq.f32.partialorder %v774_v7, %v816_v30  ;;  %v106_v31 = vpop.xlane.xlu0 %105  ;;  %316 = vmin.xlane.f32.xlu2 %v813_v28  ;;  %v130_v60 = vsub.f32 %v769_v6, %v118_v29  ;;  %v128_v9 = vsub.f32 %v774_v7, %v816_v30 }
  0x80   :  { %v308_v32 = vsel %vm300_vm4, %v294_v17, 10  ;;  %v306_v33 = vsel %vm298_vm5, %v294_v17, 10  ;;  %v126_v34 = vsub.f32 %v85_v8, %v106_v31  ;;  %vm296_vm6 = vcmp.eq.f32.partialorder %v85_v8, %v106_v31 }
  0x81   :  { %v304_v36 = vsel %vm296_vm6, %v294_v17, 10  ;;  %v824_v38 = vsel %vm100_vm0, %v308_v32, 2147483647  ;;  %v827_v39 = vsel %vm100_vm0, %v306_v33, 2147483647  ;;  %v344_v30 = vcvt.s32.f32 %v342_v26  ;;  %v92_v26 = vld [vmem:[%s1226_s2] sm:$0xff] }
  0x82   :  { %v135_v37 = vmul.f32 1.442695, %v126_v34  ;;  %v388_v41 = vshra.s32 %v824_v38, 16  ;;  %v358_v42 = vshra.s32 %v827_v39, 16  ;;  %v833_v43 = vsel %vm100_vm0, %v304_v36, 2147483647 }
  0x83   :  { %v328_v45 = vshra.s32 %v833_v43, 16  ;;  %v143_v3 = vmul.f32 1.442695, %v130_v60  ;;  %v133_v8 = vmul.f32 1.442695, %v125_v0  ;;  %v387_v35 = vand.u32 65535, %v824_v38 }
  0x84   :  { %663 = vpow2.f32 %v135_v37  ;;  %v837_v46 = vcvt.s32.f32 %v388_v41  ;;  %v839_v47 = vcvt.s32.f32 %v358_v42  ;;  %v139_v14 = vmul.f32 1.442695, %v128_v9  ;;  %v94_v9 = vld [vmem:[%s1226_s2 + $0x10] sm:$0xff] }
  0x85   :  { %v844_v49 = vcvt.s32.f32 %v328_v45  ;;  %665 = vpow2.f32 %v141_v51  ;;  %v357_v23 = vand.u32 65535, %v827_v39  ;;  %v389_v37 = vcvt.s32.f32 %v387_v35 }
  0x86   :  { %v846_v50 = vpop.xlane.xlu1 %123  ;;  %391 = vmin.xlane.f32.xlu1 %v837_v46  ;;  %667 = vpow2.f32 %v137_v53 }
  0x87   :  { %v121_v52 = vpop.xlane.xlu0 %120  ;;  %vm302_vm7 = vcmp.eq.f32.partialorder %v787_v12, %v846_v50  ;;  %361 = vmin.xlane.f32.xlu2 %v839_v47  ;;  %331 = vmin.xlane.f32.xlu0 %v844_v49  ;;  %669 = vpow2.f32 %v143_v3 }
  0x88   :  { %vm301_vm8 = vcmp.eq.f32.partialorder %v792_v13, %v121_v52  ;;  %v310_v56 = vsel %vm302_vm7, %v294_v17, 10  ;;  %671 = vpow2.f32 %v133_v8 }
  0x89   :  { %v309_v55 = vsel %vm301_vm8, %v294_v17, 10  ;;  %v865_v63 = vsel %vm100_vm0, %v310_v56, 2147483647  ;;  %673 = vpow2.f32 %v139_v14  ;;  %v131_v17 = vsub.f32 %v792_v13, %v121_v52 }
  0x8a   :  { %v856_v57 = vsel %vm100_vm0, %v309_v55, 2147483647  ;;  %v664_v58 = vpop.eup %663  ;;  %v418_v4 = vshra.s32 %v865_v63, 16  ;;  %v312_v13 = vand.u32 65535, %v807_v24  ;;  %v327_v24 = vand.u32 65535, %v833_v43 }
  0x8b   :  { %v403_v59 = vshra.s32 %v856_v57, 16  ;;  %v152_v1 = vsel %vm100_vm0, %v664_v58, 0.0  ;;  %v666_v5 = vpop.eup %665  ;;  %v145_v19 = vmul.f32 1.442695, %v131_v17  ;;  %v402_v43 = vand.u32 65535, %v856_v57 }
  0x8c   :  { %v668_v6 = vpop.eup %667  ;;  %v875_v10 = vcvt.s32.f32 %v418_v4  ;;  %v161_v2 = vsel %vm100_vm0, %v666_v5, 0.0  ;;  %v314_v32 = vcvt.s32.f32 %v312_v13  ;;  %v329_v38 = vcvt.s32.f32 %v327_v24 }
  0x8d   :  { %v862_v62 = vcvt.s32.f32 %v403_v59  ;;  %v155_v11 = vsel %vm100_vm0, %v668_v6, 0.0  ;;  %v670_v15 = vpop.eup %669  ;;  %675 = vpow2.f32 %v145_v19  ;;  %v404_v51 = vcvt.s32.f32 %v402_v43 }
  0x8e   :  { %153 = vadd.xlane.f32.xlu1 %v152_v1  ;;  %v672_v16 = vpop.eup %671  ;;  %v164_v18 = vsel %vm100_vm0, %v670_v15, 0.0  ;;  %v417_v48 = vand.u32 65535, %v865_v63 }
  0x8f   :  { %376 = vmin.xlane.f32.xlu0 %v860_v61  ;;  %406 = vmin.xlane.f32.xlu2 %v862_v62  ;;  %v149_v7 = vsel %vm100_vm0, %v672_v16, 0.0  ;;  %v674_v20 = vpop.eup %673 }
  0x90   :  { %v158_v21 = vsel %vm100_vm0, %v674_v20, 0.0  ;;  %v419_v56 = vcvt.s32.f32 %v417_v48 }
  0x93   :  { %v676_v22 = vpop.eup %675 }
  0x94   :  { %v167_v25 = vsel %vm100_vm0, %v676_v22, 0.0 }
  0x96   :  { %162 = vadd.xlane.f32.xlu1 %v161_v2 }
  0x97   :  { %421 = vmin.xlane.f32.xlu0 %v875_v10  ;;  %156 = vadd.xlane.f32.xlu2 %v155_v11 }
  0x9f   :  { %150 = vadd.xlane.f32.xlu0 %v149_v7  ;;  %165 = vadd.xlane.f32.xlu2 %v164_v18 }
  0xa7   :  { %159 = vadd.xlane.f32.xlu0 %v158_v21 }
  0xaf   :  { %168 = vadd.xlane.f32.xlu0 %v167_v25 }
  0xf1   :  { %v347_v29 = vpop.xlane.xlu1 %346 }
  0xf2   :  { %v887_v31 = vpop.xlane.xlu2 %316  ;;  %vm348_vm9 = vcmp.eq.f32.partialorder %v811_v27, %v347_v29  ;;  %v359_v27 = vcvt.s32.f32 %v357_v23  ;;  %v353_v1 = vcvt.f32.s32 %v347_v29  ;;  %v93_v23 = vld [vmem:[%s1226_s2 + $0x8] sm:$0xff] }
  0xf3   :  { %vm318_vm10 = vcmp.eq.f32.partialorder %v813_v28, %v887_v31  ;;  %v349_v33 = vsel %vm348_vm9, %v344_v30, inf  ;;  %v97_v30 = vld [vmem:[%s1226_s2 + $0x28] sm:$0xff] }
  0xf4   :  { %v319_v34 = vsel %vm318_vm10, %v314_v32, inf  ;;  %350 = vmin.xlane.f32.xlu0 %v349_v33  ;;  %v354_v4 = vshll.u32 %v353_v1, 16 }
  0xf5   :  { %320 = vmin.xlane.f32.xlu1 %v319_v34  ;;  %v95_v34 = vld [vmem:[%s1226_s2 + $0x18] sm:$0xff] }
  0xf9   :  { %v895_v36 = vpop.xlane.xlu1 %391 }
  0xfa   :  { %v897_v40 = vpop.xlane.xlu2 %361  ;;  %v899_v41 = vpop.xlane.xlu0 %331  ;;  %vm393_vm11 = vcmp.eq.f32.partialorder %v837_v46, %v895_v36  ;;  %v398_v11 = vcvt.f32.s32 %v895_v36 }
  0xfb   :  { %vm363_vm12 = vcmp.eq.f32.partialorder %v839_v47, %v897_v40  ;;  %v394_v28 = vsel %vm393_vm11, %v389_v37, inf  ;;  %vm333_vm13 = vcmp.eq.f32.partialorder %v844_v49, %v899_v41  ;;  %v374_v47 = vcvt.s32.f32 %v372_v44 }
  0xfc   :  { %v364_v42 = vsel %vm363_vm12, %v359_v27, inf  ;;  %395 = vmin.xlane.f32.xlu0 %v394_v28  ;;  %v334_v39 = vsel %vm333_vm13, %v329_v38, inf  ;;  %v132_v49 = vsub.f32 %v787_v12, %v846_v50  ;;  %v721_v12 = vmov 0.0  }
  0xfd   :  { %365 = vmin.xlane.f32.xlu1 %v364_v42  ;;  %335 = vmin.xlane.f32.xlu2 %v334_v39  ;;  %83 = vst [vmem:[#allocation2] sm:$0x3] %v721_v12  ;;  %v368_v15 = vcvt.f32.s32 %v897_v40  ;;  %v338_v18 = vcvt.f32.s32 %v899_v41  ;;  %v399_v19 = vshll.u32 %v398_v11, 16 }
  0xfe   :  { %v147_v54 = vmul.f32 1.442695, %v132_v49  ;;  %v96_v49 = vld [vmem:[%s1226_s2 + $0x20] sm:$0xff] }
  0xff   :  { %v369_v25 = vshll.u32 %v368_v15, 16 }
 0x100   :  { %677 = vpow2.f32 %v147_v54 }
 0x102   :  { %v909_v45 = vpop.xlane.xlu2 %406  ;;  %v911_v46 = vpop.xlane.xlu0 %376 }
 0x103   :  { %vm408_vm14 = vcmp.eq.f32.partialorder %v862_v62, %v909_v45  ;;  %vm378_vm15 = vcmp.eq.f32.partialorder %v860_v61, %v911_v46  ;;  %v930_v61 = vpop.xlane.xlu1 %153  ;;  %v413_v36 = vcvt.f32.s32 %v909_v45  ;;  %v383_v40 = vcvt.f32.s32 %v911_v46 }
 0x104   :  { %v409_v52 = vsel %vm408_vm14, %v404_v51, inf  ;;  %v379_v53 = vsel %vm378_vm15, %v374_v47, inf  ;;  %679 = vrcp.f32 %v930_v61  ;;  %v98_v51 = vld [vmem:[%s1226_s2 + $0x30] sm:$0xff] }
 0x105   :  { %410 = vmin.xlane.f32.xlu1 %v409_v52  ;;  %380 = vmin.xlane.f32.xlu2 %v379_v53  ;;  %v414_v39 = vshll.u32 %v413_v36, 16  ;;  %v384_v45 = vshll.u32 %v383_v40, 16 }
 0x106   :  { %v678_v58 = vpop.eup %677 }
 0x107   :  { %v170_v59 = vsel %vm100_vm0, %v678_v58, 0.0 }
 0x10a   :  { %v920_v55 = vpop.xlane.xlu0 %421  ;;  %v936_v0 = vpop.xlane.xlu2 %156 }
 0x10b   :  { %vm423_vm1 = vcmp.eq.f32.partialorder %v875_v10, %v920_v55  ;;  %v934_v63 = vpop.xlane.xlu1 %162  ;;  %v323_v10 = vcvt.f32.s32 %v887_v31  ;;  %v339_v31 = vshll.u32 %v338_v18, 16  ;;  %v979_v53 = vpop.eup %679  ;;  %v428_v48 = vcvt.f32.s32 %v920_v55 }
 0x10c   :  { %v424_v57 = vsel %vm423_vm1, %v419_v56, inf  ;;  %v189_v56 = vmul.f32 %v979_v53, %v930_v61  ;;  %vm238_vm9 = vweird.f32 %v934_v63  ;;  %vm208_vm14 = vweird.f32 %v936_v0 }
 0x10d   :  { %425 = vmin.xlane.f32.xlu2 %v424_v57  ;;  %v324_v17 = vshll.u32 %v323_v10, 16  ;;  %v429_v55 = vshll.u32 %v428_v48, 16 }
 0x112   :  { %v926_v50 = vpop.xlane.xlu0 %150  ;;  %v938_v8 = vpop.xlane.xlu2 %165 }
 0x113   :  { %vm253_vm10 = vweird.f32 %v938_v8  ;;  %v259_v40 = vand.u32 2147483648, %v938_v8 }
 0x115   :  { %171 = vadd.xlane.f32.xlu2 %v170_v59 }
 0x11a   :  { %v928_v60 = vpop.xlane.xlu0 %159 }
 0x11b   :  { %v227_v48 = vand.u32 2147483647, %v928_v60 }
 0x122   :  { %v932_v62 = vpop.xlane.xlu0 %168 }
 0x123   :  { %681 = vrcp.f32 %v932_v62  ;;  %vm268_vm12 = vweird.f32 %v932_v62 }
 0x124   :  { %683 = vrcp.f32 %v934_v63 }
 0x125   :  { %685 = vrcp.f32 %v938_v8 }
 0x126   :  { %687 = vrcp.f32 %v936_v0 }
 0x127   :  { %689 = vrcp.f32 %v928_v60 }
 0x128   :  { %691 = vrcp.f32 %v926_v50 }
 0x129   :  { %v990_v59 = vpop.eup %681 }
 0x12a   :  { %v264_v10 = vmul.f32 %v990_v59, %v932_v62  ;;  %vm269_vm13 = vweird.f32 %v990_v59 }
 0x167   :  { %v351_v3 = vpop.xlane.xlu0 %350 }
 0x168   :  { %v321_v5 = vpop.xlane.xlu1 %320  ;;  %v352_v6 = vcvt.f32.s32 %v351_v3  ;;  %v993_v3 = vpop.eup %683 }
 0x169   :  { %v322_v14 = vcvt.f32.s32 %v321_v5  ;;  %v998_v5 = vpop.eup %685  ;;  %v234_v11 = vmul.f32 %v993_v3, %v934_v63  ;;  %vm239_vm11 = vweird.f32 %v993_v3 }
 0x16a   :  { %v355_v2 = vadd.s32 %v354_v4, %v352_v6  ;;  %v99_v4 = vld [vmem:[%s1226_s2 + $0x38] sm:$0xff]  ;;  %v249_v15 = vmul.f32 %v998_v5, %v938_v8  ;;  %vm254_vm15 = vweird.f32 %v998_v5 }
 0x16b   :  { %v325_v20 = vadd.s32 %v324_v17, %v322_v14 }
 0x16c   :  { %vm433_vm0 = vcmp.eq.s32.totalorder %v355_v2, %v94_v9  ;;  %v190_v9 = vsub.f32 1.0, %v189_v56  ;;  %v1002_v2 = vpop.eup %687 }
 0x16d   :  { %v629_v16 = vsel %vm433_vm0, 1.0, %v721_v12  ;;  %vm431_vm2 = vcmp.eq.s32.totalorder %v325_v20, %v92_v26  ;;  %v1007_v14 = vpop.eup %689  ;;  %v204_v18 = vmul.f32 %v1002_v2, %v936_v0  ;;  %v250_v26 = vsub.f32 1.0, %v249_v15 }
 0x16e   :  { %511 = vrot.lane.b32.xlu0 %v629_v16, %s722_s29  ;;  %v627_v27 = vsel %vm431_vm2, 1.0, %v721_v12  ;;  %v244_v16 = vand.u32 2147483648, %v934_v63  ;;  %v191_v17 = vmul.f32 %v979_v53, %v190_v9  ;;  %vm223_vm0 = vweird.f32 %v928_v60  ;;  %vm1063_vm2 = vmor %vm268_vm12, %vm269_vm13 }
 0x16f   :  { %v396_v7 = vpop.xlane.xlu0 %395  ;;  %v251_v36 = vmul.f32 %v998_v5, %v250_v26  ;;  %vm1094_vm12 = vmor %vm238_vm9, %vm239_vm11  ;;  %vm209_vm13 = vweird.f32 %v1002_v2 }
 0x170   :  { %v366_v21 = vpop.xlane.xlu1 %365  ;;  %v397_v22 = vcvt.f32.s32 %v396_v7  ;;  %v336_v29 = vpop.xlane.xlu2 %335  ;;  %v265_v7 = vsub.f32 1.0, %v264_v10 }
 0x171   :  { %v367_v13 = vcvt.f32.s32 %v366_v21  ;;  %v337_v32 = vcvt.f32.s32 %v336_v29  ;;  %v235_v21 = vsub.f32 1.0, %v234_v11  ;;  %v214_v29 = vand.u32 2147483648, %v936_v0 }
 0x172   :  { %v400_v33 = vadd.s32 %v399_v19, %v397_v22  ;;  %v219_v22 = vmul.f32 %v1007_v14, %v928_v60 }
 0x173   :  { %v370_v35 = vadd.s32 %v369_v25, %v367_v13  ;;  %v340_v24 = vadd.s32 %v339_v31, %v337_v32  ;;  %v199_v25 = vand.u32 2147483648, %v930_v61  ;;  %v1023_v13 = vpop.eup %691  ;;  %v205_v31 = vsub.f32 1.0, %v204_v18 }
 0x174   :  { %vm436_vm3 = vcmp.eq.s32.totalorder %v400_v33, %v97_v30  ;;  %v1027_v30 = vor.u32 1.1754944e-38, %v244_v16  ;;  %v266_v32 = vmul.f32 %v990_v59, %v265_v7  ;;  %v212_v33 = vand.u32 2147483647, %v936_v0  ;;  %v661_v7 = vld [vmem:[%s1224_s0] ss:$0 sm:$0xff] }
 0x175   :  { %vm434_vm4 = vcmp.eq.s32.totalorder %v370_v35, %v95_v34  ;;  %v632_v37 = vsel %vm436_vm3, 1.0, %v721_v12  ;;  %vm432_vm5 = vcmp.eq.s32.totalorder %v340_v24, %v93_v23  ;;  %v1033_v34 = vadd.f32 %v979_v53, %v191_v17 }
 0x176   :  { %v630_v41 = vsel %vm434_vm4, 1.0, %v721_v12  ;;  %517 = vrot.lane.b32.xlu0 %v632_v37, %s722_s29  ;;  %v628_v28 = vsel %vm432_vm5, 1.0, %v721_v12  ;;  %v236_v35 = vmul.f32 %v993_v3, %v235_v21  ;;  %v220_v23 = vsub.f32 1.0, %v219_v22 }
 0x177   :  { %513 = vrot.lane.b32.xlu2 %v630_v41, %s722_s29  ;;  %v656_v42 = vpack.i.bf16 %v628_v28, %v627_v27  ;;  %v174_v24 = vmul.f32 %v1023_v13, %v926_v50  ;;  %v274_v41 = vand.u32 2147483648, %v932_v62  ;;  %v272_v27 = vand.u32 2147483647, %v932_v62 }
 0x178   :  { %v411_v38 = vpop.xlane.xlu1 %410  ;;  %v381_v44 = vpop.xlane.xlu2 %380  ;;  %v257_v28 = vand.u32 2147483647, %v938_v8  ;;  %vm194_vm3 = vweird.f32 %v979_v53  ;;  %vm193_vm4 = vweird.f32 %v930_v61  ;;  %v200_v0 = vor.u32 1.1754944e-38, %v199_v25 }
 0x179   :  { %v412_v43 = vcvt.f32.s32 %v411_v38  ;;  %v382_v46 = vcvt.f32.s32 %v381_v44  ;;  %657 = vrot.lane.b32.xlu1 %v656_v42, %s722_s29  ;;  %v206_v38 = vmul.f32 %v1002_v2, %v205_v31  ;;  %v221_v44 = vmul.f32 %v1007_v14, %v220_v23 }
 0x17a   :  { %vm1073_vm5 = vcmp.eq.f32.partialorder %v272_v27, 8.507059e+37  ;;  %v197_v31 = vand.u32 2147483647, %v930_v61  ;;  %v184_v23 = vand.u32 2147483648, %v926_v50 }
 0x17b   :  { %v415_v47 = vadd.s32 %v414_v39, %v412_v43  ;;  %v385_v52 = vadd.s32 %v384_v45, %v382_v46  ;;  %v267_v39 = vadd.f32 %v990_v59, %v266_v32  ;;  %v229_v45 = vand.u32 2147483648, %v928_v60 }
 0x17c   :  { %v222_v9 = vadd.f32 %v1007_v14, %v221_v44  ;;  %v207_v11 = vadd.f32 %v1002_v2, %v206_v38  ;;  %v723_v32 = vmov 1.0  }
 0x17d   :  { %vm437_vm6 = vcmp.eq.s32.totalorder %v415_v47, %v98_v51  ;;  %vm435_vm7 = vcmp.eq.s32.totalorder %v385_v52, %v96_v49  ;;  %v237_v51 = vadd.f32 %v993_v3, %v236_v35  ;;  %v175_v47 = vsub.f32 1.0, %v174_v24 }
 0x17e   :  { %v633_v54 = vsel %vm437_vm6, 1.0, %v721_v12  ;;  %v631_v58 = vsel %vm435_vm7, 1.0, %v721_v12  ;;  %v252_v52 = vadd.f32 %v998_v5, %v251_v36  ;;  %vm1081_vm6 = vmor %vm253_vm10, %vm254_vm15  ;;  %vm224_vm7 = vweird.f32 %v1007_v14 }
 0x17f   :  { %519 = vrot.lane.b32.xlu2 %v633_v54, %s722_s29  ;;  %v275_v54 = vor.u32 1.1754944e-38, %v274_v41  ;;  %vm1098_vm10 = vcmp.eq.f32.partialorder %v257_v28, 8.507059e+37  ;;  %vm1110_vm9 = vmor %vm223_vm0, %vm224_vm7  ;;  %v230_v15 = vor.u32 1.1754944e-38, %v229_v45  ;;  %v241_v18 = vsel %vm1094_vm12, %v993_v3, %v237_v51 }
 0x180   :  { %v426_v57 = vpop.xlane.xlu2 %425  ;;  %v226_v22 = vsel %vm1110_vm9, %v1007_v14, %v222_v9  ;;  %vm1150_vm12 = vmor %vm208_vm14, %vm209_vm13  ;;  %vm178_vm9 = vweird.f32 %v926_v50 }
 0x181   :  { %v427_v1 = vcvt.f32.s32 %v426_v57  ;;  %515 = vrot.lane.b32.xlu1 %v631_v58, %s722_s29 }
 0x183   :  { %v430_v6 = vadd.s32 %v429_v55, %v427_v1  ;;  %v271_v1 = vsel %vm1063_vm2, %v990_v59, %v267_v39  ;;  %vm1129_vm2 = vcmp.eq.f32.partialorder %v227_v48, 8.507059e+37 }
 0x184   :  { %v1117_v17 = vsel %vm1073_vm5, %v275_v54, %v271_v1  ;;  %v596_v54 = vld [vmem:[#allocation2] sm:$0x3] }
 0x185   :  { %vm438_vm8 = vcmp.eq.s32.totalorder %v430_v6, %v99_v4  ;;  %v260_v4 = vor.u32 1.1754944e-38, %v259_v40  ;;  %vm464_vm7 = vcmp.gt.f32.partialorder %v1117_v17, %v661_v7 }
 0x186   :  { %v634_v20 = vsel %vm438_vm8, 1.0, %v721_v12  ;;  %v242_v12 = vand.u32 2147483647, %v934_v63  ;;  %v256_v63 = vsel %vm1081_vm6, %v998_v5, %v252_v52  ;;  %v176_v5 = vmul.f32 %v1023_v13, %v175_v47 }
 0x187   :  { %v1137_v3 = vsel %vm1098_vm10, %v260_v4, %v256_v63 }
 0x188   :  { %v1015_v19 = vpop.xlane.xlu2 %171  ;;  %vm1052_vm1 = vcmp.eq.f32.partialorder %v242_v12, 8.507059e+37  ;;  %v215_v12 = vor.u32 1.1754944e-38, %v214_v29  ;;  %vm463_vm14 = vcmp.gt.f32.partialorder %v1137_v3, %v661_v7  ;;  %v211_v29 = vsel %vm1150_vm12, %v1002_v2, %v207_v11 }
 0x189   :  { %693 = vrcp.f32 %v1015_v19  ;;  %521 = vrot.lane.b32.xlu1 %v634_v20, %s722_s29  ;;  %v289_v56 = vand.u32 2147483648, %v1015_v19  ;;  %v287_v55 = vand.u32 2147483647, %v1015_v19  ;;  %vm283_vm15 = vweird.f32 %v1015_v19 }
 0x18a   :  { %v1159_v14 = vsel %vm1052_vm1, %v1027_v30, %v241_v18  ;;  %vm1172_vm1 = vmor %vm193_vm4, %vm194_vm3  ;;  %v177_v35 = vadd.f32 %v1023_v13, %v176_v5  ;;  %v231_v2 = vsel %vm1129_vm2, %v230_v15, %v226_v22  ;;  %vm213_vm3 = vcmp.eq.f32.partialorder %v212_v33, 8.507059e+37 }
 0x18b   :  { %v290_v16 = vor.u32 1.1754944e-38, %v289_v56  ;;  %vm288_vm0 = vcmp.eq.f32.partialorder %v287_v55, 8.507059e+37  ;;  %vm462_vm4 = vcmp.gt.f32.partialorder %v1159_v14, %v661_v7  ;;  %v196_v24 = vsel %vm1172_vm1, %v979_v53, %v1033_v34 }
 0x18c   :  { %v216_v33 = vsel %vm213_vm3, %v215_v12, %v211_v29  ;;  %v185_v34 = vor.u32 1.1754944e-38, %v184_v23 }
 0x18f   :  { %v694_v37 = vpop.eup %693 }
 0x190   :  { %v279_v42 = vmul.f32 %v694_v37, %v1015_v19  ;;  %vm284_vm8 = vweird.f32 %v694_v37  ;;  %v662_v19 = vld [vmem:[%s1224_s0 + $0x1] ss:$0 sm:$0xff]  ;;  %s724_s0 = smov [#allocation2]  }
 0x191   :  { %vm285_vm11 = vmor %vm283_vm15, %vm284_vm8  ;;  %vm473_vm8 = vcmp.le.f32.partialorder %v1117_v17, %v662_v19  ;;  %vm179_vm15 = vweird.f32 %v1023_v13  ;;  %vm472_vm13 = vcmp.le.f32.partialorder %v1137_v3, %v662_v19  ;;  %s604_s20 = sshll.u32 %s724_s0, 4  ;;  %s605_s20 = int_to_ptr.vmem [resolvable:$true] %s604_s20 }
 0x192   :  { %v280_v49 = vsub.f32 1.0, %v279_v42  ;;  %vm480_vm2 = vmand %vm463_vm14, %vm472_vm13 }
 0x194   :  { %v281_v58 = vmul.f32 %v694_v37, %v280_v49 }
 0x196   :  { %v282_v59 = vadd.f32 %v694_v37, %v281_v58 }
 0x198   :  { %v286_v60 = vsel %vm285_vm11, %v694_v37, %v282_v59  ;;  %vm481_vm11 = vmand %vm464_vm7, %vm473_vm8  ;;  %v182_v37 = vand.u32 2147483647, %v926_v50  ;;  %vm470_vm7 = vcmp.le.f32.partialorder %v231_v2, %v662_v19  ;;  %vm198_vm8 = vcmp.eq.f32.partialorder %v197_v31, 8.507059e+37 }
 0x199   :  { %v1133_v21 = vsel %vm288_vm0, %v290_v16, %v286_v60  ;;  %vm471_vm0 = vcmp.le.f32.partialorder %v1159_v14, %v662_v19  ;;  %v201_v50 = vsel %vm198_vm8, %v200_v0, %v196_v24 }
 0x19a   :  { %vm465_vm5 = vcmp.gt.f32.partialorder %v1133_v21, %v661_v7  ;;  %vm474_vm6 = vcmp.le.f32.partialorder %v1133_v21, %v662_v19  ;;  %vm479_vm12 = vmand %vm462_vm4, %vm471_vm0  ;;  %vm183_vm1 = vcmp.eq.f32.partialorder %v182_v37, 8.507059e+37  ;;  %vm459_vm14 = vcmp.gt.f32.partialorder %v201_v50, %v661_v7 }
 0x19b   :  { %vm482_vm10 = vmand %vm465_vm5, %vm474_vm6  ;;  %vm461_vm6 = vcmp.gt.f32.partialorder %v231_v2, %v661_v7  ;;  %vm468_vm13 = vcmp.le.f32.partialorder %v201_v50, %v662_v19  ;;  %vm531_vm4 = vcmask 7168  }
 0x19c   :  { %643 = vmatpush.msk.msra.mxu0 %vm482_vm10, %v723_v32  ;;  %vm1195_vm5 = vmor %vm178_vm9, %vm179_vm15  ;;  %vm460_vm10 = vcmp.gt.f32.partialorder %v216_v33, %v661_v7  ;;  %vm469_vm15 = vcmp.le.f32.partialorder %v216_v33, %v662_v19 }
 0x19d   :  { %v181_v53 = vsel %vm1195_vm5, %v1023_v13, %v177_v35  ;;  %vm478_vm9 = vmand %vm461_vm6, %vm470_vm7  ;;  %vm572_vm6 = vcmask 523264  }
 0x19e   :  { %644 = vmatpush.msk.msra.mxu0 %vm481_vm11, %v723_v32  ;;  %v186_v61 = vsel %vm183_vm1, %v185_v34, %v181_v53  ;;  %vm477_vm11 = vmand %vm460_vm10, %vm469_vm15 }
 0x19f   :  { %vm458_vm3 = vcmp.gt.f32.partialorder %v186_v61, %v661_v7  ;;  %vm476_vm5 = vmand %vm459_vm14, %vm468_vm13 }
 0x1a0   :  { %645 = vmatpush.msk.msra.mxu0 %vm480_vm2, %v723_v32  ;;  %vm467_vm2 = vcmp.le.f32.partialorder %v186_v61, %v662_v19 }
 0x1a1   :  { %vm475_vm0 = vmand %vm458_vm3, %vm467_vm2 }
 0x1a2   :  { %646 = vmatpush.msk.msra.mxu0 %vm479_vm12, %v723_v32 }
 0x1a4   :  { %647 = vmatpush.msk.msra.mxu0 %vm478_vm9, %v723_v32 }
 0x1a6   :  { %648 = vmatpush.msk.msra.mxu0 %vm477_vm11, %v723_v32 }
 0x1a8   :  { %649 = vmatpush.msk.msra.mxu0 %vm476_vm5, %v723_v32 }
 0x1aa   :  { %650 = vmatpush.msk.msra.mxu0 %vm475_vm0, %v723_v32 }
 0x1d1   :  { %v514_v42 = vpop.permute.xlu2 %513 }
 0x1d2   :  { %v535_v39 = vsel %vm531_vm4, %v231_v2, %v514_v42 }
 0x1d9   :  { %v520_v51 = vpop.permute.xlu2 %519 }
 0x1da   :  { %v538_v47 = vsel %vm531_vm4, %v1117_v17, %v520_v51 }
 0x1e0   :  { %v512_v28 = vpop.permute.xlu0 %511 }
 0x1e1   :  { %v534_v38 = vsel %vm531_vm4, %v216_v33, %v512_v28 }
 0x1e8   :  { %v518_v45 = vpop.permute.xlu0 %517 }
 0x1e9   :  { %v537_v46 = vsel %vm531_vm4, %v1137_v3, %v518_v45 }
 0x1eb   :  { %v658_v25 = vpop.permute.xlu1 %657 }
 0x1ec   :  { %v659_v13 = vunpack.i.l.bf16 %v658_v25  ;;  %v660_v41 = vunpack.i.h.bf16 %v658_v25 }
 0x1ee   :  { %v532_v40 = vsel %vm531_vm4, %v186_v61, %v659_v13  ;;  %v533_v27 = vsel %vm531_vm4, %v201_v50, %v660_v41 }
 0x1ef   :  { %540 = vxpose.xlu0.b32.start [1/8] (short) (narrow) %v532_v40, 8 }
 0x1f3   :  { %v516_v43 = vpop.permute.xlu1 %515 }
 0x1f4   :  { %v536_v44 = vsel %vm531_vm4, %v1159_v14, %v516_v43 }
 0x1f7   :  { %541 = vxpose.xlu0.b32.cont [2/8] (short) (narrow) %v533_v27, 8 }
 0x1fb   :  { %v522_v49 = vpop.permute.xlu1 %521 }
 0x1fc   :  { %v539_v52 = vsel %vm531_vm4, %v1133_v21, %v522_v49 }
 0x1ff   :  { %542 = vxpose.xlu0.b32.cont [3/8] (short) (narrow) %v534_v38, 8 }
 0x207   :  { %543 = vxpose.xlu0.b32.cont [4/8] (short) (narrow) %v535_v39, 8 }
 0x20f   :  { %544 = vxpose.xlu0.b32.cont [5/8] (short) (narrow) %v536_v44, 8 }
 0x217   :  { %545 = vxpose.xlu0.b32.cont [6/8] (short) (narrow) %v537_v46, 8 }
 0x21f   :  { %546 = vxpose.xlu0.b32.cont [7/8] (short) (narrow) %v538_v47, 8 }
 0x227   :  { %547 = vxpose.xlu0.b32.end [8/8] (short) (narrow) %v539_v52, 8 }
 0x293   :  { %v556_v48 = vpop.trf.xlu0 }
 0x294   :  { %651 = vmatmul.msk.f32.vlgmr.msra.gmra.mxu0 %vm572_vm6, %v556_v48 }
 0x311   :  { %v593_v56 = vpop.f32.mrf.mxu0 }
 0x312   :  { %v597_v62 = vadd.f32 %v596_v54, %v593_v56 }
 0x314   :  { %598 = vst [vmem:[#allocation2] sm:$0x3] %v597_v62 }
 0x315   :  { %609 = dma.vmem_to_hbm [thread:$0]  %s605_s20, 32, %s607_s23, [#allocation3]  }
 0x316   :  { %719 = dma.done.wait [#allocation3], 32  }
 0x317   :  { %720 = vsyncadd [#allocation3], 4294967264 }
 0x318   :  { %614 = vsyncpa [#allocation3], 1 }

</bundles_post_ra>
